<compile_context>
chip_gen: v5e
topology: v5e:2x2
jax: 0.10.0
libtpu: 0.0.40
codegen_flags: <defaults>
</compile_context>

<pallas_src>
import functools
import math

import jax
import jax.numpy as jnp
from jax.experimental import pallas as pl
from jax.experimental.pallas import tpu as pltpu


def _round_up(a, m):
    return (a + m - 1) // m * m


def _embed_kernel(xp_ref, xc_ref, xn_ref, pos_ref, w_ref, o_ref, *, d_model):
    # Circular conv-as-matmul: three K=c_in matmuls accumulated in f32 (MXU).
    acc = jnp.dot(xp_ref[...], w_ref[0], preferred_element_type=jnp.float32)
    acc = acc + jnp.dot(xc_ref[...], w_ref[1], preferred_element_type=jnp.float32)
    acc = acc + jnp.dot(xn_ref[...], w_ref[2], preferred_element_type=jnp.float32)

    # Fixed sinusoidal positional embedding generated in-kernel (EUP is idle
    # in this HBM-bound kernel, so sin/cos/exp are effectively free).
    cols = jax.lax.broadcasted_iota(jnp.int32, acc.shape, 1)
    parity = cols & 1                                  # 0 -> sin column, 1 -> cos column
    scale = -math.log(10000.0) / d_model
    div = jnp.exp((cols - parity).astype(jnp.float32) * scale)
    angle = pos_ref[...] * div                         # (T,1) * (T,Dpad) broadcast
    pe = jnp.where(parity == 0, jnp.sin(angle), jnp.cos(angle))

    o_ref[...] = (acc + pe).astype(o_ref.dtype)


def data_embedding_onlypos(x, conv_w, x_mark=None, *, out_dtype=None):
    """x: (B, L, c_in); conv_w: (d_model, c_in, 3).  Returns (B, L, d_model).

    x_mark is accepted for API parity with the PyTorch module but unused
    (DataEmbedding_onlypos ignores it).  Dropout(p=0.1) is identity (eval mode).
    """
    del x_mark  # unused by the "onlypos" embedding
    B, L, c_in = x.shape
    d_model = conv_w.shape[0]
    out_dtype = jnp.dtype(out_dtype if out_dtype is not None else x.dtype)

    R = B * L
    d_pad = _round_up(d_model, 128)          # lane-dense output (unmasked vst)

    # Largest row tile (multiple of 8, <= 1024 rows) whose double-buffered
    # output block stays under ~16 MiB -> safe on v7x's 64 MiB VMEM while still
    # near the measured HBM-roofline sweet spot (512-1024 rows) on v5e/v6e.
    tile_cap = max(8, min(1024, ((16 << 20) // (2 * d_pad * out_dtype.itemsize)) // 8 * 8))
    tile_r = min(tile_cap, _round_up(R, 8))
    r_pad = _round_up(R, tile_r)

    # Circular shifts taken per batch BEFORE flattening, so the circular
    # boundary never crosses a batch or row-tile boundary.
    x_prev = jnp.roll(x, 1, axis=1).reshape(R, c_in)    # x[(t-1) mod L]
    x_next = jnp.roll(x, -1, axis=1).reshape(R, c_in)   # x[(t+1) mod L]
    x_mid = x.reshape(R, c_in)

    pos = jnp.broadcast_to(jnp.arange(L, dtype=jnp.float32), (B, L)).reshape(R, 1)

    def pad_rows(a):
        return a if r_pad == R else jnp.pad(a, ((0, r_pad - R), (0, 0)))

    x_prev, x_mid, x_next, pos = map(pad_rows, (x_prev, x_mid, x_next, pos))

    # Conv weight -> (3, c_in, d_pad): w[k, c, o] = conv_w[o, c, k] (cross-corr).
    w = jnp.transpose(conv_w, (2, 1, 0)).astype(jnp.float32)
    if d_pad != d_model:
        w = jnp.pad(w, ((0, 0), (0, 0), (0, d_pad - d_model)))

    grid = (r_pad // tile_r,)
    row_spec = pl.BlockSpec((tile_r, c_in), lambda i: (i, 0))

    # Explicit VMEM budget: double-buffered in/out blocks + resident weights,
    # with headroom; same code fits v7x (64 MiB) and big tiles on v5e/v6e.
    vmem_need = (2 * tile_r * d_pad * out_dtype.itemsize
                 + 2 * 3 * tile_r * c_in * 4
                 + 2 * tile_r * 4
                 + 2 * 3 * c_in * d_pad * 4)
    vmem_limit = int(min(max(2 * vmem_need, 8 << 20), 40 << 20))

    cost = pl.CostEstimate(
        flops=2 * r_pad * 3 * c_in * d_pad,
        transcendentals=2 * r_pad * d_pad,
        bytes_accessed=(3 * r_pad * c_in * 4 + r_pad * 4 + 3 * c_in * d_pad * 4
                        + r_pad * d_pad * out_dtype.itemsize),
    )

    out = pl.pallas_call(
        functools.partial(_embed_kernel, d_model=d_model),
        out_shape=jax.ShapeDtypeStruct((r_pad, d_pad), out_dtype),
        grid_spec=pltpu.PrefetchScalarGridSpec(
            num_scalar_prefetch=0,
            grid=grid,
            in_specs=[
                row_spec,                                            # x_prev rows
                row_spec,                                            # x rows
                row_spec,                                            # x_next rows
                pl.BlockSpec((tile_r, 1), lambda i: (i, 0)),         # position col
                pl.BlockSpec((3, c_in, d_pad), lambda i: (0, 0, 0)),  # weights (resident)
            ],
            out_specs=pl.BlockSpec((tile_r, d_pad), lambda i: (i, 0)),
        ),
        compiler_params=pltpu.CompilerParams(
            dimension_semantics=("parallel",),
            vmem_limit_bytes=vmem_limit,
        ),
        cost_estimate=cost,
    )(x_prev, x_mid, x_next, pos, w)

    # TODO(synk): Dropout(p=0.1) omitted (module evaluated in inference mode).
    return out[:R, :d_model].reshape(B, L, d_model)


def _reference(x, conv_w):
    """Pure-JAX reference of the PyTorch forward (eval mode)."""
    B, L, c_in = x.shape
    d_model = conv_w.shape[0]
    x_t = jnp.transpose(x, (0, 2, 1))                       # (B, c_in, L)
    x_pad = jnp.concatenate([x_t[:, :, -1:], x_t, x_t[:, :, :1]], axis=-1)
    out = jnp.zeros((B, d_model, L), dtype=jnp.float32)
    for k in range(3):
        out = out + jnp.einsum('oc,bcl->bol', conv_w[:, :, k], x_pad[:, :, k:k + L])
    out = jnp.transpose(out, (0, 2, 1))                     # (B, L, d_model)
    position = jnp.arange(L, dtype=jnp.float32)[:, None]
    div_term = jnp.exp(jnp.arange(0, d_model, 2, dtype=jnp.float32)
                       * (-math.log(10000.0) / d_model))
    pe = jnp.zeros((L, d_model), dtype=jnp.float32)
    pe = pe.at[:, 0::2].set(jnp.sin(position * div_term))
    pe = pe.at[:, 1::2].set(jnp.cos(position * div_term)[:, : d_model // 2])
    return out + pe[None]


if __name__ == "__main__":
    key = jax.random.PRNGKey(0)

    def kaiming_conv_w(k, d_model, c_in):
        # Kaiming-normal, fan_in mode, leaky_relu (negative_slope=0.01)
        fan_in = c_in * 3
        gain = math.sqrt(2.0 / (1.0 + 0.01 ** 2))
        std = gain / math.sqrt(fan_in)
        return std * jax.random.normal(k, (d_model, c_in, 3), dtype=jnp.float32)

    # Second config exercises row padding, lane padding, and odd d_model.
    for case, (B, L, c_in, d_model) in enumerate([(2, 8, 4, 32), (2, 9, 5, 33)]):
        kx, kw, km, key = jax.random.split(key, 4)
        x = jax.random.normal(kx, (B, L, c_in), dtype=jnp.float32)
        x_mark = jax.random.normal(km, (B, L, 4), dtype=jnp.float32)  # unused by onlypos
        conv_w = kaiming_conv_w(kw, d_model, c_in)

        out = data_embedding_onlypos(x, conv_w, x_mark)
        out = jax.block_until_ready(out)

        ref = _reference(x, conv_w)
        assert out.shape == (B, L, d_model)
        assert jnp.allclose(out, ref, atol=1e-4, rtol=1e-4), f"mismatch vs reference (case {case})"

    print("KERNEL_OK")
</pallas_src>

<mosaic_0001>
module attributes {stable_mosaic.version = 11 : i64} {
  func.func @_embed_kernel(%arg0: i32, %arg1: memref<16x4xf32, #tpu.memory_space<vmem>>, %arg2: memref<16x4xf32, #tpu.memory_space<vmem>>, %arg3: memref<16x4xf32, #tpu.memory_space<vmem>>, %arg4: memref<16x1xf32, #tpu.memory_space<vmem>>, %arg5: memref<3x4x128xf32, #tpu.memory_space<vmem>>, %arg6: memref<16x128xf32, #tpu.memory_space<vmem>>) attributes {dimension_semantics = [#tpu.dimension_semantics<parallel>], iteration_bounds = array<i64: 1>, scalar_prefetch = 0 : i64, scratch_operands = 0 : i64, tpu.core_type = #tpu.core_type<tc>, window_params = [{transform_indices = @transform_0, window_bounds = array<i64: 16, 4>}, {transform_indices = @transform_1, window_bounds = array<i64: 16, 4>}, {transform_indices = @transform_2, window_bounds = array<i64: 16, 4>}, {transform_indices = @transform_3, window_bounds = array<i64: 16, 1>}, {pipeline_mode = #tpu.pipeline_mode<synchronous>, transform_indices = @transform_4, window_bounds = array<i64: 3, 4, 128>}, {transform_indices = @transform_5, window_bounds = array<i64: 16, 128>}]} {
    %c0 = arith.constant 0 : index
    %c0_0 = arith.constant 0 : index
    %0 = vector.load %arg1[%c0, %c0_0] : memref<16x4xf32, #tpu.memory_space<vmem>>, vector<16x4xf32>
    %c0_1 = arith.constant 0 : index
    %c0_2 = arith.constant 0 : index
    %c0_3 = arith.constant 0 : index
    %1 = vector.load %arg5[%c0_1, %c0_2, %c0_3] : memref<3x4x128xf32, #tpu.memory_space<vmem>>, vector<1x4x128xf32>
    %2 = vector.shape_cast %1 : vector<1x4x128xf32> to vector<4x128xf32>
    %cst = arith.constant dense<0.000000e+00> : vector<16x128xf32>
    %3 = tpu.matmul %0, %2, %cst {dimension_numbers = #tpu.dot_dimension_numbers<[1], [0], [0], [1], [0, 0, 1, 1], [], []>} : vector<16x4xf32>, vector<4x128xf32>, vector<16x128xf32> -> vector<16x128xf32>
    %c0_4 = arith.constant 0 : index
    %c0_5 = arith.constant 0 : index
    %4 = vector.load %arg2[%c0_4, %c0_5] : memref<16x4xf32, #tpu.memory_space<vmem>>, vector<16x4xf32>
    %c1 = arith.constant 1 : index
    %c0_6 = arith.constant 0 : index
    %c0_7 = arith.constant 0 : index
    %5 = vector.load %arg5[%c1, %c0_6, %c0_7] : memref<3x4x128xf32, #tpu.memory_space<vmem>>, vector<1x4x128xf32>
    %6 = vector.shape_cast %5 : vector<1x4x128xf32> to vector<4x128xf32>
    %cst_8 = arith.constant dense<0.000000e+00> : vector<16x128xf32>
    %7 = tpu.matmul %4, %6, %cst_8 {dimension_numbers = #tpu.dot_dimension_numbers<[1], [0], [0], [1], [0, 0, 1, 1], [], []>} : vector<16x4xf32>, vector<4x128xf32>, vector<16x128xf32> -> vector<16x128xf32>
    %8 = arith.addf %3, %7 : vector<16x128xf32>
    %c0_9 = arith.constant 0 : index
    %c0_10 = arith.constant 0 : index
    %9 = vector.load %arg3[%c0_9, %c0_10] : memref<16x4xf32, #tpu.memory_space<vmem>>, vector<16x4xf32>
    %c2 = arith.constant 2 : index
    %c0_11 = arith.constant 0 : index
    %c0_12 = arith.constant 0 : index
    %10 = vector.load %arg5[%c2, %c0_11, %c0_12] : memref<3x4x128xf32, #tpu.memory_space<vmem>>, vector<1x4x128xf32>
    %11 = vector.shape_cast %10 : vector<1x4x128xf32> to vector<4x128xf32>
    %cst_13 = arith.constant dense<0.000000e+00> : vector<16x128xf32>
    %12 = tpu.matmul %9, %11, %cst_13 {dimension_numbers = #tpu.dot_dimension_numbers<[1], [0], [0], [1], [0, 0, 1, 1], [], []>} : vector<16x4xf32>, vector<4x128xf32>, vector<16x128xf32> -> vector<16x128xf32>
    %13 = arith.addf %8, %12 : vector<16x128xf32>
    %14 = tpu.iota {dimensions = array<i32: 1>} : vector<16x128xi32>
    %c1_i32 = arith.constant 1 : i32
    %15 = vector.broadcast %c1_i32 : i32 to vector<16x128xi32>
    %16 = arith.andi %14, %15 : vector<16x128xi32>
    %17 = arith.subi %14, %16 : vector<16x128xi32>
    %18 = arith.sitofp %17 : vector<16x128xi32> to vector<16x128xf32>
    %cst_14 = arith.constant -0.287823141 : f32
    %19 = vector.broadcast %cst_14 : f32 to vector<16x128xf32>
    %20 = arith.mulf %18, %19 : vector<16x128xf32>
    %21 = math.exp %20 : vector<16x128xf32>
    %c0_15 = arith.constant 0 : index
    %c0_16 = arith.constant 0 : index
    %22 = vector.load %arg4[%c0_15, %c0_16] : memref<16x1xf32, #tpu.memory_space<vmem>>, vector<16x1xf32>
    %23 = vector.broadcast %22 : vector<16x1xf32> to vector<16x128xf32>
    %24 = arith.mulf %23, %21 : vector<16x128xf32>
    %c0_i32 = arith.constant 0 : i32
    %25 = vector.broadcast %c0_i32 : i32 to vector<16x128xi32>
    %26 = arith.cmpi eq, %16, %25 : vector<16x128xi32>
    %27 = math.sin %24 : vector<16x128xf32>
    %28 = math.cos %24 : vector<16x128xf32>
    %29 = arith.select %26, %27, %28 : vector<16x128xi1>, vector<16x128xf32>
    %30 = arith.addf %13, %29 : vector<16x128xf32>
    %c0_17 = arith.constant 0 : index
    %c0_18 = arith.constant 0 : index
    %31 = vector.load %arg6[%c0_17, %c0_18] : memref<16x128xf32, #tpu.memory_space<vmem>>, vector<16x128xf32>
    tpu.vector_store %arg6[%c0_17, %c0_18], %30 {strides = array<i32>} : memref<16x128xf32, #tpu.memory_space<vmem>>, vector<16x128xf32>,
    return
  }
  func.func @transform_0(%arg0: i32) -> (i32, i32) {
    %c0_i32 = arith.constant 0 : i32
    %c0_i32_0 = arith.constant 0 : i32
    return %arg0, %c0_i32 : i32, i32
  }
  func.func @transform_1(%arg0: i32) -> (i32, i32) {
    %c0_i32 = arith.constant 0 : i32
    %c0_i32_0 = arith.constant 0 : i32
    return %arg0, %c0_i32 : i32, i32
  }
  func.func @transform_2(%arg0: i32) -> (i32, i32) {
    %c0_i32 = arith.constant 0 : i32
    %c0_i32_0 = arith.constant 0 : i32
    return %arg0, %c0_i32 : i32, i32
  }
  func.func @transform_3(%arg0: i32) -> (i32, i32) {
    %c0_i32 = arith.constant 0 : i32
    %c0_i32_0 = arith.constant 0 : i32
    return %arg0, %c0_i32 : i32, i32
  }
  func.func @transform_4(%arg0: i32) -> (i32, i32, i32) {
    %c0_i32 = arith.constant 0 : i32
    %c0_i32_0 = arith.constant 0 : i32
    %c0_i32_1 = arith.constant 0 : i32
    %c0_i32_2 = arith.constant 0 : i32
    return %c0_i32, %c0_i32_0, %c0_i32_1 : i32, i32, i32
  }
  func.func @transform_5(%arg0: i32) -> (i32, i32) {
    %c0_i32 = arith.constant 0 : i32
    %c0_i32_0 = arith.constant 0 : i32
    return %arg0, %c0_i32 : i32, i32
  }
}

</mosaic_0001>

<bundles_post_ra>
// kernel: tpu_custom_call.1
= control target key start
LH: loop header
LB: loop body
LE: loop exit
PB: predicated region body
PF: predicated region fallthrough
CT: control target
= control target key end

     0   :  { %vm35_vm0 = vcmask 1043456   ;;  %v860_v2 = vmov 0   ;;  %vm28_vm1 = vcmask 31744   ;;  %s1116_s0 = inlined_call_operand.vmem [shape: f32[16,4], index: 0, kind: input, shape index: {}]   ;;  %s1117_s1 = inlined_call_operand.vmem [shape: f32[16,4], index: 1, kind: input, shape index: {}]   ;;  %s1118_s2 = inlined_call_operand.vmem [shape: f32[16,4], index: 2, kind: input, shape index: {}]   ;;  %s1119_s3 = inlined_call_operand.vmem [shape: f32[16,1], index: 3, kind: input, shape index: {}]   ;;  %s1120_s4 = inlined_call_operand.vmem [shape: f32[3,4,128], index: 4, kind: input, shape index: {}]   ;;  %s1121_s5 = inlined_call_operand.hbm [shape: f32[16,128], index: 5, kind: output, shape index: {}]  }
   0x1   :  { %v140_v0 = vld [vmem:[%s1119_s3] sm:$0xff]  ;;  %v804_v1 = vld [vmem:[%s1120_s4 + $0x8] sm:$0xf]  ;;  %831 = vset.pattern.permute.xlu0 %v860_v2 }
   0x2   :  { %805 = vmatpush.msk.msra.mxu2 %vm35_vm0, %v804_v1  ;;  %v94_v3 = vld [vmem:[%s1118_s2] sm:$0xff]  ;;  %144 = vperm.xlu0 %831, %v140_v0   ;;  %v25_v8 = vld [vmem:[%s1117_s1 + $0x8] sm:$0xff] }
   0x3   :  { %v797_v4 = vld [vmem:[%s1120_s4 + $0x4] sm:$0xf]  ;;  %v23_v5 = vld [vmem:[%s1120_s4] sm:$0xf]  ;;  %806 = vmatmul.msk.f32.vlgmr.msra.gmra.mxu2 %vm28_vm1, %v94_v3 }
   0x4   :  { %v24_v6 = vld [vmem:[%s1117_s1] sm:$0xff]  ;;  %798 = vmatpush.msk.msra.mxu0 %vm35_vm0, %v797_v4  ;;  %801 = vmatpush.msk.msra.mxu1 %vm35_vm0, %v23_v5 }
   0x5   :  { %v21_v7 = vld [vmem:[%s1116_s0] sm:$0xff]  ;;  %799 = vmatmul.msk.f32.vlgmr.msra.gmra.mxu0 %vm28_vm1, %v24_v6  ;;  %820 = vmatpush.msk.msra.mxu3 %vm35_vm0, %v797_v4 }
   0x6   :  { %802 = vmatmul.msk.f32.vlgmr.msra.gmra.mxu1 %vm28_vm1, %v21_v7 }
   0x7   :  { %10 = vsyncpa [#allocation3], 0  ;;  %800 = vmatmul.msk.f32.vlgmr.msra.gmra.mxu3 %vm28_vm1, %v25_v8  ;;  %v141_v9 = vld [vmem:[%s1119_s3 + $0x8] sm:$0xff]  ;;  %v132_v12 = vlaneseq  ;;  %v861_v41 = vmov 683565275   ;;  %s785_s14 = sshll.u32 %s1121_s5, 4  ;;  %s786_s14 = int_to_ptr.hbm [resolvable:$true] %s785_s14 }
   0x8   :  { %v95_v10 = vld [vmem:[%s1118_s2 + $0x8] sm:$0xff]  ;;  %v862_v43 = vmov 2475754826   ;;  %v863_v45 = vmov 2131351028   ;;  %s868_s15 = smov 128  }
   0x9   :  { %v22_v11 = vld [vmem:[%s1116_s0 + $0x8] sm:$0xff]  ;;  %v944_v13 = vand.u32 127, %v132_v12  ;;  %v864_v47 = vmov 2102212464   ;;  %v865_v52 = vmov 920167782  }
   0xa   :  { %149 = vperm.xlu0 %831, %v141_v9   ;;  %v866_v55 = vmov 1326507024   ;;  %s867_s0 = smov [#allocation2]   ;;  %s869_s16 = smov 8  }
   0xb   :  { %807 = vmatmul.msk.f32.gmra.mxu2 %vm28_vm1, %v95_v10  ;;  %v134_v14 = vand.u32 1, %v944_v13  ;;  %s783_s1 = sshll.u32 %s867_s0, 4  ;;  %s784_s1 = int_to_ptr.vmem [resolvable:$true] %s783_s1 }
   0xd   :  { %v135_v15 = vsub.s32 %v944_v13, %v134_v14 }
   0xe   :  { %803 = vmatmul.msk.f32.gmra.mxu1 %vm28_vm1, %v22_v11 }
   0xf   :  { %v136_v16 = vcvt.s32.f32 %v135_v15 }
  0x11   :  { %v137_v17 = vmul.f32 -0.28782314, %v136_v16 }
  0x13   :  { %v138_v18 = vmul.f32 1.442695, %v137_v17 }
  0x15   :  { %832 = vpow2.f32 %v138_v18 }
  0x1b   :  { %v833_v19 = vpop.eup %832 }
  0x74   :  { %v145_v20 = vpop.permute.xlu0 %144 }
  0x75   :  { %v950_v21 = vmul.f32 %v833_v19, %v145_v20 }
  0x77   :  { %v155_v22 = vand.u32 2147483647, %v950_v21  ;;  %v158_v23 = vand.u32 2139095040, %v950_v21 }
  0x79   :  { %v159_v24 = vshrl.u32 %v158_v23, 23  ;;  %v162_v25 = vand.u32 8388607, %v155_v22 }
  0x7b   :  { %v808_v26 = vadd.s32 4294967169, %v159_v24  ;;  %v163_v27 = vor.u32 8388608, %v162_v25 }
  0x7c   :  { %v150_v28 = vpop.permute.xlu0 %149 }
  0x7d   :  { %v165_v29 = vadd.s32 1, %v808_v26  ;;  %v956_v30 = vmul.f32 %v833_v19, %v150_v28  ;;  %v958_v31 = vshll.u32 %v163_v27, 8 }
  0x7f   :  { %vm166_vm2 = vcmp.gt.s32.totalorder %v165_v29, 0  ;;  %v310_v32 = vand.u32 2147483647, %v956_v30  ;;  %v313_v34 = vand.u32 2139095040, %v956_v30  ;;  %v204_v38 = vand.u32 65535, %v958_v31 }
  0x80   :  { %v167_v33 = vsel %vm166_vm2, %v165_v29, 0  ;;  %v205_v16 = vshrl.u32 %v958_v31, 16 }
  0x81   :  { %v169_v35 = vand.u32 31, %v167_v33  ;;  %v168_v36 = vshrl.u32 %v167_v33, 5  ;;  %v314_v39 = vshrl.u32 %v313_v34, 23  ;;  %v317_v40 = vand.u32 8388607, %v310_v32 }
  0x83   :  { %v170_v37 = vsub.s32 32, %v169_v35  ;;  %v172_v42 = vshll.u32 %v861_v41, %v169_v35  ;;  %v175_v44 = vshll.u32 %v862_v43, %v169_v35  ;;  %v178_v46 = vshll.u32 %v863_v45, %v169_v35 }
  0x84   :  { %v181_v48 = vshll.u32 %v864_v47, %v169_v35  ;;  %v184_v53 = vshll.u32 %v865_v52, %v169_v35  ;;  %vm187_vm3 = vcmp.lt.s32.totalorder %v168_v36, 1  ;;  %vm188_vm4 = vcmp.lt.s32.totalorder %v168_v36, 2 }
  0x85   :  { %v173_v49 = vshrl.u32 %v862_v43, %v170_v37  ;;  %v176_v50 = vshrl.u32 %v863_v45, %v170_v37  ;;  %v179_v51 = vshrl.u32 %v864_v47, %v170_v37  ;;  %v182_v54 = vshrl.u32 %v865_v52, %v170_v37 }
  0x86   :  { %v185_v56 = vshrl.u32 %v866_v55, %v170_v37  ;;  %v811_v60 = vadd.s32 4294967169, %v314_v39  ;;  %v171_v61 = vshrl.u32 %v861_v41, %v170_v37  ;;  %vm190_vm5 = vcmp.lt.s32.totalorder %v168_v36, 4 }
  0x87   :  { %v174_v57 = vor.u32 %v173_v49, %v172_v42  ;;  %v177_v58 = vor.u32 %v176_v50, %v175_v44  ;;  %v180_v59 = vor.u32 %v179_v51, %v178_v46  ;;  %v183_v62 = vor.u32 %v182_v54, %v181_v48 }
  0x88   :  { %v186_v63 = vor.u32 %v185_v56, %v184_v53  ;;  %vm189_vm6 = vcmp.lt.s32.totalorder %v168_v36, 3  ;;  %v318_v6 = vor.u32 8388608, %v317_v40  ;;  %v320_v7 = vadd.s32 1, %v811_v60 }
  0x89   :  { %v192_v0 = vsel %vm190_vm5, %v180_v59, 2102212464  ;;  %v195_v1 = vsel %vm187_vm3, %v174_v57, %v177_v58  ;;  %v199_v3 = vsel %vm187_vm3, %v177_v58, %v180_v59  ;;  %v196_v4 = vsel %vm190_vm5, %v183_v62, 920167782 }
  0x8a   :  { %v200_v5 = vsel %vm190_vm5, %v186_v63, 1326507024  ;;  %v191_v8 = vsel %vm187_vm3, %v171_v61, %v174_v57  ;;  %v193_v9 = vsel %vm189_vm6, %v177_v58, %v192_v0  ;;  %v197_v10 = vsel %vm189_vm6, %v180_v59, %v196_v4 }
  0x8b   :  { %v201_v11 = vsel %vm189_vm6, %v183_v62, %v200_v5  ;;  %v198_v12 = vsel %vm188_vm4, %v195_v1, %v197_v10  ;;  %vm321_vm7 = vcmp.gt.s32.totalorder %v320_v7, 0  ;;  %v983_v23 = vsel %vm188_vm4, %v191_v8, %v193_v9 }
  0x8c   :  { %v202_v15 = vsel %vm188_vm4, %v199_v3, %v201_v11  ;;  %v228_v19 = vand.u32 65535, %v198_v12  ;;  %v229_v20 = vshrl.u32 %v198_v12, 16  ;;  %v322_v26 = vsel %vm321_vm7, %v320_v7, 0 }
  0x8d   :  { %v206_v17 = vand.u32 65535, %v202_v15  ;;  %v207_v18 = vshrl.u32 %v202_v15, 16  ;;  %v985_v27 = vshll.u32 %v318_v6, 8  ;;  %v324_v50 = vand.u32 31, %v322_v26 }
  0x8e   :  { %v231_v33 = vmul.u32 %v229_v20, %v204_v38  ;;  %v232_v34 = vmul.u32 %v228_v19, %v205_v16  ;;  %v230_v39 = vmul.u32 %v228_v19, %v204_v38  ;;  %v233_v40 = vmul.u32 %v229_v20, %v205_v16 }
  0x8f   :  { %v209_v24 = vmul.u32 %v207_v18, %v204_v38  ;;  %v210_v25 = vmul.u32 %v206_v17, %v205_v16  ;;  %v208_v28 = vmul.u32 %v206_v17, %v204_v38  ;;  %v211_v29 = vmul.u32 %v207_v18, %v205_v16 }
  0x90   :  { %v234_v46 = vshll.u32 %v231_v33, 16  ;;  %v235_v48 = vshrl.u32 %v231_v33, 16  ;;  %v236_v49 = vshll.u32 %v232_v34, 16  ;;  %v237_v53 = vshrl.u32 %v232_v34, 16 }
  0x91   :  { %v212_v35 = vshll.u32 %v209_v24, 16  ;;  %v213_v37 = vshrl.u32 %v209_v24, 16  ;;  %v214_v42 = vshll.u32 %v210_v25, 16  ;;  %v215_v44 = vshrl.u32 %v210_v25, 16 }
  0x92   :  { %vm238_vm9 = vc.u32 %v230_v39, %v234_v46  ;;  %v240_v54 = vadd.s32 %v234_v46, %v230_v39  ;;  %v989_v58 = vsub.s32 32, %v324_v50  ;;  %v992_v60 = vshrl.u32 %v322_v26, 5 }
  0x93   :  { %vm216_vm8 = vc.u32 %v208_v28, %v212_v35  ;;  %v218_v36 = vadd.s32 %v212_v35, %v208_v28  ;;  %v239_v57 = vsel %vm238_vm9, 1, %v860_v2  ;;  %v327_v0 = vshll.u32 %v861_v41, %v324_v50 }
  0x94   :  { %v217_v51 = vsel %vm216_vm8, 1, %v860_v2  ;;  %v241_v59 = vadd.s32 %v239_v57, %v233_v40  ;;  %vm242_vm11 = vc.u32 %v240_v54, %v236_v49  ;;  %v995_v63 = vadd.s32 %v240_v54, %v236_v49 }
  0x95   :  { %v219_v56 = vadd.s32 %v217_v51, %v211_v29  ;;  %vm220_vm10 = vc.u32 %v218_v36, %v214_v42  ;;  %v243_v62 = vsel %vm242_vm11, 1, %v860_v2  ;;  %v328_v3 = vshrl.u32 %v862_v43, %v989_v58 }
  0x96   :  { %v221_v38 = vsel %vm220_vm10, 1, %v860_v2  ;;  %v245_v1 = vadd.s32 %v243_v62, %v241_v59  ;;  %v330_v4 = vshll.u32 %v862_v43, %v324_v50  ;;  %v331_v5 = vshrl.u32 %v863_v45, %v989_v58 }
  0x97   :  { %v223_v61 = vadd.s32 %v221_v38, %v219_v56  ;;  %v333_v7 = vshll.u32 %v863_v45, %v324_v50  ;;  %v334_v8 = vshrl.u32 %v864_v47, %v989_v58  ;;  %v336_v9 = vshll.u32 %v864_v47, %v324_v50 }
  0x98   :  { %v246_v10 = vadd.s32 %v245_v1, %v235_v48  ;;  %v1007_v11 = vor.u32 %v328_v3, %v327_v0  ;;  %v1009_v12 = vor.u32 %v331_v5, %v330_v4  ;;  %v337_v15 = vshrl.u32 %v865_v52, %v989_v58 }
  0x99   :  { %v224_v6 = vadd.s32 %v223_v61, %v213_v37  ;;  %v335_v16 = vor.u32 %v334_v8, %v333_v7  ;;  %v339_v17 = vshll.u32 %v865_v52, %v324_v50  ;;  %v340_v45 = vshrl.u32 %v866_v55, %v989_v58 }
  0x9a   :  { %v247_v18 = vadd.s32 %v246_v10, %v237_v53  ;;  %v338_v19 = vor.u32 %v337_v15, %v336_v9  ;;  %v248_v47 = vmul.u32 %v958_v31, %v983_v23  ;;  %vm342_vm13 = vcmp.lt.s32.totalorder %v992_v60, 1 }
  0x9b   :  { %v1013_v43 = vadd.s32 %v224_v6, %v215_v44  ;;  %v341_v20 = vor.u32 %v340_v45, %v339_v17  ;;  %vm345_vm14 = vcmp.lt.s32.totalorder %v992_v60, 4  ;;  %v350_v52 = vsel %vm342_vm13, %v1007_v11, %v1009_v12 }
  0x9c   :  { %v251_v24 = vadd.s32 1, %v247_v18  ;;  %v359_v55 = vand.u32 65535, %v985_v27  ;;  %vm344_vm15 = vcmp.lt.s32.totalorder %v992_v60, 3  ;;  %v351_v31 = vsel %vm345_vm14, %v338_v19, 920167782 }
  0x9d   :  { %vm250_vm12 = vc.u32 %v1013_v43, %v995_v63  ;;  %v354_v23 = vsel %vm342_vm13, %v1009_v12, %v335_v16  ;;  %v355_v25 = vsel %vm345_vm14, %v341_v20, 1326507024  ;;  %vm343_vm0 = vcmp.lt.s32.totalorder %v992_v60, 2 }
  0x9e   :  { %v252_v26 = vsel %vm250_vm12, %v251_v24, %v247_v18  ;;  %v352_v28 = vsel %vm344_vm15, %v335_v16, %v351_v31  ;;  %v356_v29 = vsel %vm344_vm15, %v338_v19, %v355_v25  ;;  %v360_v37 = vshrl.u32 %v985_v27, 16 }
  0x9f   :  { %v253_v33 = vadd.s32 %v252_v26, %v248_v47  ;;  %v353_v34 = vsel %vm343_vm0, %v350_v52, %v352_v28  ;;  %v357_v35 = vsel %vm343_vm0, %v354_v23, %v356_v29  ;;  %v347_v57 = vsel %vm345_vm14, %v335_v16, 2102212464 }
  0xa0   :  { %v361_v39 = vand.u32 65535, %v357_v35  ;;  %v362_v40 = vshrl.u32 %v357_v35, 16  ;;  %v383_v42 = vand.u32 65535, %v353_v34  ;;  %v384_v44 = vshrl.u32 %v353_v34, 16 }
  0xa1   :  { %v254_v46 = vadd.s32 536870912, %v253_v33  ;;  %v326_v18 = vshrl.u32 %v861_v41, %v989_v58  ;;  %v348_v23 = vsel %vm344_vm15, %v1009_v12, %v347_v57  ;;  %v249_v34 = vadd.s32 %v995_v63, %v1013_v43 }
  0xa2   :  { %v364_v48 = vmul.u32 %v362_v40, %v359_v55  ;;  %v365_v36 = vmul.u32 %v361_v39, %v360_v37  ;;  %v386_v50 = vmul.u32 %v384_v44, %v359_v55  ;;  %v387_v51 = vmul.u32 %v383_v42, %v360_v37 }
  0xa3   :  { %v1047_v49 = vshrl.u32 %v254_v46, 30  ;;  %v363_v53 = vmul.u32 %v361_v39, %v359_v55  ;;  %v366_v38 = vmul.u32 %v362_v40, %v360_v37  ;;  %v385_v0 = vmul.u32 %v383_v42, %v359_v55 }
  0xa4   :  { %v367_v54 = vshll.u32 %v364_v48, 16  ;;  %v389_v59 = vshll.u32 %v386_v50, 16  ;;  %v369_v61 = vshll.u32 %v365_v36, 16  ;;  %v388_v4 = vmul.u32 %v384_v44, %v360_v37 }
  0xa5   :  { %v256_v56 = vshll.u32 %v1047_v49, 30  ;;  %v391_v5 = vshll.u32 %v387_v51, 16  ;;  %v368_v15 = vshrl.u32 %v364_v48, 16  ;;  %v370_v19 = vshrl.u32 %v365_v36, 16 }
  0xa6   :  { %vm371_vm1 = vc.u32 %v363_v53, %v367_v54  ;;  %v373_v62 = vadd.s32 %v367_v54, %v363_v53  ;;  %vm393_vm3 = vc.u32 %v385_v0, %v389_v59  ;;  %v395_v7 = vadd.s32 %v389_v59, %v385_v0 }
  0xa7   :  { %v257_v1 = vsub.s32 %v253_v33, %v256_v56  ;;  %v372_v3 = vsel %vm371_vm1, 1, %v860_v2  ;;  %v394_v10 = vsel %vm393_vm3, 1, %v860_v2  ;;  %v390_v52 = vshrl.u32 %v386_v50, 16 }
  0xa8   :  { %v374_v6 = vadd.s32 %v372_v3, %v366_v38  ;;  %vm375_vm2 = vc.u32 %v373_v62, %v369_v61  ;;  %v396_v17 = vadd.s32 %v394_v10, %v388_v4  ;;  %vm397_vm5 = vc.u32 %v395_v7, %v391_v5 }
  0xa9   :  { %vm258_vm4 = vcmp.lt.s32.totalorder %v257_v1, 0  ;;  %v259_v8 = vsub.s32 0, %v257_v1  ;;  %v376_v9 = vsel %vm375_vm2, 1, %v860_v2  ;;  %v398_v47 = vsel %vm397_vm5, 1, %v860_v2 }
  0xaa   :  { %v378_v16 = vadd.s32 %v376_v9, %v374_v6  ;;  %v400_v55 = vadd.s32 %v398_v47, %v396_v17  ;;  %v346_v31 = vsel %vm342_vm13, %v326_v18, %v1007_v11  ;;  %v392_v28 = vshrl.u32 %v387_v51, 16 }
  0xab   :  { %v260_v45 = vsel %vm258_vm4, %v259_v8, %v257_v1  ;;  %v399_v41 = vadd.s32 %v395_v7, %v391_v5  ;;  %v349_v2 = vsel %vm343_vm0, %v346_v31, %v348_v23  ;;  %vm157_vm8 = vcmp.lt.s32.totalorder %v950_v21, 0  ;;  %v56_v23 = vpop.f32.mrf.mxu0 }
  0xac   :  { %v261_v20 = vclz %v260_v45  ;;  %v379_v24 = vadd.s32 %v378_v16, %v368_v15  ;;  %v401_v29 = vadd.s32 %v400_v55, %v390_v52  ;;  %v403_v12 = vmul.u32 %v985_v27, %v349_v2 }
  0xad   :  { %vm156_vm10 = vcmp.le.f32.partialorder %v155_v22, 0.7853982  ;;  %v279_v59 = vsub.s32 4, %v1047_v49  ;;  %vm298_vm12 = vweird.f32 %v950_v21  ;;  %vm312_vm13 = vcmp.lt.s32.totalorder %v956_v30, 0 }
  0xae   :  { %v809_v25 = vadd.s32 4294967294, %v261_v20  ;;  %v380_v26 = vadd.s32 %v379_v24, %v370_v19  ;;  %v402_v58 = vadd.s32 %v401_v29, %v392_v28  ;;  %vm1082_vm3 = vcmp.eq.s32.totalorder %v134_v14, 0 }
  0xaf   :  { %v280_v3 = vsel %vm157_vm8, %v279_v59, %v1047_v49  ;;  %vm1088_vm5 = vcmp.le.f32.partialorder %v310_v32, 0.7853982 }
  0xb0   :  { %vm810_vm6 = vcmp.lt.s32.totalorder %v809_v25, 0  ;;  %vm405_vm7 = vc.u32 %v380_v26, %v399_v41  ;;  %v406_v37 = vadd.s32 1, %v402_v58  ;;  %v282_v10 = vsel %vm156_vm10, 0, %v280_v3 }
  0xb1   :  { %v264_v33 = vsel %vm810_vm6, 0, %v809_v25  ;;  %v404_v15 = vadd.s32 %v399_v41, %v380_v26  ;;  %v299_v52 = vadd.s32 3, %v282_v10  ;;  %v88_v25 = vpop.f32.mrf.mxu1 }
  0xb2   :  { %v265_v11 = vsub.s32 32, %v264_v33  ;;  %v269_v35 = vsub.s32 4294967266, %v264_v33  ;;  %v266_v39 = vshll.u32 %v257_v1, %v264_v33  ;;  %v407_v44 = vsel %vm405_vm7, %v406_v37, %v402_v58 }
  0xb3   :  { %v408_v46 = vadd.s32 %v407_v44, %v403_v12  ;;  %v609_v58 = vand.u32 3, %v282_v10  ;;  %v300_v41 = vand.u32 3, %v299_v52 }
  0xb4   :  { %v267_v40 = vshrl.u32 %v249_v34, %v265_v11  ;;  %v270_v42 = vadd.s32 127, %v269_v35  ;;  %v89_v11 = vadd.f32 %v88_v25, %v56_v23  ;;  %v124_v35 = vpop.f32.mrf.mxu2 }
  0xb5   :  { %v409_v60 = vadd.s32 536870912, %v408_v46  ;;  %vm610_vm14 = vcmp.lt.s32.totalorder %v609_v58, 2  ;;  %vm611_vm15 = vcmp.eq.s32.totalorder %v609_v58, 0  ;;  %vm301_vm0 = vcmp.lt.s32.totalorder %v300_v41, 2 }
  0xb6   :  { %v268_v48 = vor.u32 %v267_v40, %v266_v39  ;;  %v271_v36 = vshll.u32 %v270_v42, 23  ;;  %vm302_vm1 = vcmp.eq.s32.totalorder %v300_v41, 0  ;;  %vm614_vm2 = vcmp.eq.s32.totalorder %v609_v58, 2 }
  0xb7   :  { %v1069_v51 = vshrl.u32 %v409_v60, 30  ;;  %v130_v44 = vadd.f32 %v124_v35, %v89_v11  ;;  %vm305_vm4 = vcmp.eq.s32.totalorder %v300_v41, 2 }
  0xb8   :  { %v272_v50 = vor.u32 4788187, %v271_v36  ;;  %v275_v54 = vcvt.s32.f32 %v268_v48 }
  0xb9   :  { %v411_v63 = vshll.u32 %v1069_v51, 30  ;;  %v434_v14 = vsub.s32 4, %v1069_v51 }
  0xba   :  { %v273_v53 = vand.u32 2147483647, %v272_v50 }
  0xbb   :  { %v412_v56 = vsub.s32 %v408_v46, %v411_v63 }
  0xbc   :  { %v276_v43 = vmul.f32 %v275_v54, %v273_v53 }
  0xbd   :  { %vm413_vm9 = vcmp.lt.s32.totalorder %v412_v56, 0  ;;  %v414_v27 = vsub.s32 0, %v412_v56 }
  0xbe   :  { %v277_v57 = vxor.u32 2147483648, %v276_v43 }
  0xbf   :  { %v415_v62 = vsel %vm413_vm9, %v414_v27, %v412_v56 }
  0xc0   :  { %v278_v38 = vsel %vm157_vm8, %v277_v57, %v276_v43  ;;  %v416_v1 = vclz %v415_v62  ;;  %v435_v62 = vsel %vm312_vm13, %v434_v14, %v1069_v51  ;;  %v127_v51 = vpop.f32.mrf.mxu2 }
  0xc1   :  { %v281_v61 = vsel %vm156_vm10, %v950_v21, %v278_v38  ;;  %v437_v3 = vsel %vm1088_vm5, 0, %v435_v62 }
  0xc2   :  { %v283_v0 = vmul.f32 %v281_v61, %v281_v61  ;;  %v812_v4 = vadd.s32 4294967294, %v416_v1 }
  0xc4   :  { %v284_v5 = vmul.f32 -0.001358992, %v283_v0  ;;  %v291_v6 = vmul.f32 -0.00019511016, %v283_v0  ;;  %vm813_vm11 = vcmp.lt.s32.totalorder %v812_v4, 0 }
  0xc5   :  { %v419_v9 = vsel %vm813_vm11, 0, %v812_v4 }
  0xc6   :  { %v285_v7 = vadd.f32 0.041655596, %v284_v5  ;;  %v292_v8 = vadd.f32 0.008332121, %v291_v6  ;;  %v420_v22 = vsub.s32 32, %v419_v9  ;;  %v424_v16 = vsub.s32 4294967266, %v419_v9 }
  0xc7   :  { %v421_v18 = vshll.u32 %v412_v56, %v419_v9  ;;  %v454_v9 = vadd.s32 3, %v437_v3 }
  0xc8   :  { %v286_v17 = vmul.f32 %v285_v7, %v283_v0  ;;  %v293_v45 = vmul.f32 %v292_v8, %v283_v0  ;;  %v422_v19 = vshrl.u32 %v404_v15, %v420_v22  ;;  %v425_v47 = vadd.s32 127, %v424_v16  ;;  %v59_v7 = vpop.f32.mrf.mxu3  ;;  %v91_v8 = vpop.f32.mrf.mxu1 }
  0xc9   :  { %v92_v22 = vadd.f32 %v91_v8, %v59_v7 }
  0xca   :  { %v287_v20 = vadd.f32 -0.4999988, %v286_v17  ;;  %v294_v24 = vadd.f32 -0.16666654, %v293_v45  ;;  %v423_v49 = vor.u32 %v422_v19, %v421_v18  ;;  %v426_v55 = vshll.u32 %v425_v47, 23 }
  0xcb   :  { %v763_v45 = vand.u32 3, %v437_v3  ;;  %v455_v18 = vand.u32 3, %v454_v9 }
  0xcc   :  { %v288_v31 = vmul.f32 %v287_v20, %v283_v0  ;;  %v295_v28 = vmul.f32 %v294_v24, %v283_v0  ;;  %v427_v29 = vor.u32 4788187, %v426_v55  ;;  %v430_v34 = vcvt.s32.f32 %v423_v49 }
  0xcd   :  { %v131_v20 = vadd.f32 %v127_v51, %v92_v22  ;;  %vm764_vm6 = vcmp.lt.s32.totalorder %v763_v45, 2  ;;  %vm765_vm7 = vcmp.eq.s32.totalorder %v763_v45, 0  ;;  %vm456_vm8 = vcmp.lt.s32.totalorder %v455_v18, 2 }
  0xce   :  { %v289_v2 = vadd.f32 1.0, %v288_v31  ;;  %v296_v26 = vadd.f32 1.0, %v295_v28  ;;  %v428_v33 = vand.u32 2147483647, %v427_v29  ;;  %vm457_vm9 = vcmp.eq.s32.totalorder %v455_v18, 0 }
  0xcf   :  { %vm460_vm10 = vcmp.eq.s32.totalorder %v455_v18, 2  ;;  %vm768_vm11 = vcmp.eq.s32.totalorder %v763_v45, 2 }
  0xd0   :  { %v297_v37 = vmul.f32 %v296_v26, %v281_v61  ;;  %v306_v12 = vxor.u32 2147483648, %v289_v2  ;;  %v431_v39 = vmul.f32 %v430_v34, %v428_v33 }
  0xd2   :  { %v303_v40 = vxor.u32 2147483648, %v297_v37  ;;  %v432_v42 = vxor.u32 2147483648, %v431_v39  ;;  %v307_v36 = vsel %vm305_vm4, %v306_v12, %v297_v37  ;;  %v616_v50 = vsel %vm614_vm2, %v306_v12, %v297_v37 }
  0xd4   :  { %v304_v48 = vsel %vm302_vm1, %v289_v2, %v303_v40  ;;  %v613_v60 = vsel %vm611_vm15, %v289_v2, %v303_v40  ;;  %v433_v54 = vsel %vm312_vm13, %v432_v42, %v431_v39 }
  0xd5   :  { %v308_v63 = vsel %vm301_vm0, %v304_v48, %v307_v36  ;;  %v617_v13 = vsel %vm610_vm14, %v613_v60, %v616_v50  ;;  %v436_v43 = vsel %vm1088_vm5, %v956_v30, %v433_v54 }
  0xd6   :  { %v309_v56 = vsel %vm298_vm12, nan, %v308_v63  ;;  %v618_v32 = vsel %vm298_vm12, nan, %v617_v13  ;;  %v438_v57 = vmul.f32 %v436_v43, %v436_v43  ;;  %vm453_vm12 = vweird.f32 %v956_v30 }
  0xd7   :  { %v773_v27 = vsel %vm1082_vm3, %v309_v56, %v618_v32 }
  0xd8   :  { %v775_v38 = vadd.f32 %v773_v27, %v130_v44  ;;  %v439_v59 = vmul.f32 -0.001358992, %v438_v57  ;;  %v446_v61 = vmul.f32 -0.00019511016, %v438_v57 }
  0xda   :  { %777 = vst [vmem:[#allocation2] sm:$0xff] %v775_v38  ;;  %v440_v0 = vadd.f32 0.041655596, %v439_v59  ;;  %v447_v1 = vadd.f32 0.008332121, %v446_v61 }
  0xdc   :  { %v441_v4 = vmul.f32 %v440_v0, %v438_v57  ;;  %v448_v21 = vmul.f32 %v447_v1, %v438_v57 }
  0xde   :  { %v442_v5 = vadd.f32 -0.4999988, %v441_v4  ;;  %v449_v6 = vadd.f32 -0.16666654, %v448_v21 }
  0xe0   :  { %v443_v10 = vmul.f32 %v442_v5, %v438_v57  ;;  %v450_v15 = vmul.f32 %v449_v6, %v438_v57 }
  0xe2   :  { %v444_v16 = vadd.f32 1.0, %v443_v10  ;;  %v451_v17 = vadd.f32 1.0, %v450_v15 }
  0xe4   :  { %v452_v19 = vmul.f32 %v451_v17, %v436_v43  ;;  %v461_v47 = vxor.u32 2147483648, %v444_v16 }
  0xe6   :  { %v458_v24 = vxor.u32 2147483648, %v452_v19  ;;  %v462_v49 = vsel %vm460_vm10, %v461_v47, %v452_v19  ;;  %v770_v31 = vsel %vm768_vm11, %v461_v47, %v452_v19 }
  0xe8   :  { %v459_v52 = vsel %vm457_vm9, %v444_v16, %v458_v24  ;;  %v767_v55 = vsel %vm765_vm7, %v444_v16, %v458_v24 }
  0xe9   :  { %v463_v23 = vsel %vm456_vm8, %v459_v52, %v462_v49  ;;  %v771_v25 = vsel %vm764_vm6, %v767_v55, %v770_v31 }
  0xea   :  { %v464_v28 = vsel %vm453_vm12, nan, %v463_v23  ;;  %v772_v29 = vsel %vm453_vm12, nan, %v771_v25 }
  0xeb   :  { %v774_v2 = vsel %vm1082_vm3, %v464_v28, %v772_v29 }
  0xec   :  { %v776_v58 = vadd.f32 %v774_v2, %v131_v20 }
  0xee   :  { %778 = vst [vmem:[#allocation2 + $0x8] sm:$0xff] %v776_v58 }
  0xef   :  { %791 = dma.vmem_to_hbm [thread:$0]  %s784_s1, 256, %s786_s14, [#allocation3], %s868_s15, %s868_s15, %s869_s16  }
  0xf0   :  { %858 = dma.done.wait [#allocation3], 256  }
  0xf1   :  { %859 = vsyncadd [#allocation3], 4294967040 }
  0xf2   :  { %796 = vsyncpa [#allocation3], 1 }

</bundles_post_ra>
